<compile_context>
chip_gen: v7x
topology: tpu7x:2x2x1
jax: 0.10.0
libtpu: 0.0.40
codegen_flags: <defaults>
</compile_context>

<pallas_src>
import math

import jax
import jax.numpy as jnp
from jax import lax
from jax.experimental import pallas as pl
from jax.experimental.pallas import tpu as pltpu

_OUT_SUB, _OUT_LANE = 8, 128          # lane-dense per-pair output tile (unmasked vst)
_SMALL_PATH_LIMIT = 12 * 1024 * 1024  # whole-pair working-set budget for the small path
_PACK_BLOCK_BYTES = 2 * 1024 * 1024   # packed-input budget per grid step (small path)
_CHUNK_BLOCK_BYTES = 8 * 1024 * 1024  # per-chunk input budget (tiled path)
_EPS = 1e-30                          # rsqrt guard (ref would NaN on constant feats)

_VMEM_LIMIT_CACHE = [None]


def _vmem_limit_bytes():
    """~80% of physical VMEM, capped at 100 MiB (defaults are only 16/32 MiB)."""
    if _VMEM_LIMIT_CACHE[0] is None:
        try:
            cap = int(pltpu.get_tpu_info().vmem_capacity_bytes)
        except Exception:  # conservative fallback that also fits v7x's 64 MiB
            cap = 64 * 1024 * 1024
        _VMEM_LIMIT_CACHE[0] = int(min(cap * 4 // 5, 100 * 1024 * 1024))
    return _VMEM_LIMIT_CACHE[0]


def _use_n_sided(n, d1, d2):
    """Static FLOP choice: 2 NxN grams vs 3 DxD grams."""
    return n * (d1 + d2) < (d1 * d2 + d1 * d1 + d2 * d2)


def _whole_pair_vmem_bytes(n, d1, d2, itemsize):
    """Rough working-set estimate for processing one whole pair in VMEM."""
    in_bytes = n * (d1 + d2) * itemsize
    f32_bytes = n * (d1 + d2) * 4
    if _use_n_sided(n, d1, d2):
        gram = 2 * n * n * 4
    else:
        gram = (max(d1 * d2, d1 * d1, d2 * d2) + n * max(d1, d2)) * 4
    return 2 * in_bytes + f32_bytes + gram


# ---------------------------------------------------------------------------
# Small-pair path: whole pair(s) per grid step, B pairs packed per step.
# ---------------------------------------------------------------------------
def _make_small_kernel(b, n, d1, d2, use_bf16):
    n_sided = _use_n_sided(n, d1, d2)
    inv_sqrt_n = 1.0 / math.sqrt(n)

    def kernel(x_ref, y_ref, out_ref):
        # Static unroll over B packed pairs (amortizes ~0.35us/step overhead).
        for bi in range(b):
            x = x_ref[bi].astype(jnp.float32)          # (N, D1)
            y = y_ref[bi].astype(jnp.float32)          # (N, D2)
            # Column-center; 1/sqrt(N) scaling is CKA-invariant and keeps the
            # HSIC sums well inside f32 range.
            x_c = (x - jnp.mean(x, axis=0, keepdims=True)) * inv_sqrt_n
            y_c = (y - jnp.mean(y, axis=0, keepdims=True)) * inv_sqrt_n
            xm = x_c.astype(jnp.bfloat16) if use_bf16 else x_c
            ym = y_c.astype(jnp.bfloat16) if use_bf16 else y_c
            if n_sided:
                gx = lax.dot_general(xm, xm, (((1,), (1,)), ((), ())),
                                     preferred_element_type=jnp.float32)   # (N, N)
                hsic_xx = jnp.sum(gx * gx)
                gy = lax.dot_general(ym, ym, (((1,), (1,)), ((), ())),
                                     preferred_element_type=jnp.float32)   # (N, N)
                hsic_yy = jnp.sum(gy * gy)
                hsic_xy = jnp.sum(gx * gy)              # = ||Xc^T Yc||_F^2
            else:
                xt = xm.T                               # materialized once, reused twice
                xty = jnp.dot(xt, ym, preferred_element_type=jnp.float32)  # (D1, D2)
                hsic_xy = jnp.sum(xty * xty)
                xtx = jnp.dot(xt, xm, preferred_element_type=jnp.float32)  # (D1, D1)
                hsic_xx = jnp.sum(xtx * xtx)
                yty = lax.dot_general(ym, ym, (((0,), (0,)), ((), ())),
                                      preferred_element_type=jnp.float32)  # (D2, D2)
                hsic_yy = jnp.sum(yty * yty)
            # Split rsqrt avoids the hsic_xx*hsic_yy f32 overflow of the naive form.
            cka = hsic_xy * lax.rsqrt(jnp.maximum(hsic_xx, _EPS)) \
                          * lax.rsqrt(jnp.maximum(hsic_yy, _EPS))
            out_ref[bi] = jnp.full((_OUT_SUB, _OUT_LANE), jnp.float32(1.0) - cka,
                                   dtype=jnp.float32)

    return kernel


def _pick_pack(p, pair_in_bytes):
    """Largest divisor of P whose packed input block stays under the budget."""
    b_max = max(1, min(p, _PACK_BLOCK_BYTES // max(pair_in_bytes, 1)))
    b = 1
    for cand in range(1, int(b_max) + 1):
        if p % cand == 0:
            b = cand
    return b


def _small_group_losses(xs, ys, use_bf16):
    """xs: (P, N, D1), ys: (P, N, D2) same-shape group -> (P,) losses."""
    p, n, d1 = xs.shape
    d2 = ys.shape[2]
    pair_bytes = n * (d1 * xs.dtype.itemsize + d2 * ys.dtype.itemsize)
    b = _pick_pack(p, pair_bytes)
    if _use_n_sided(n, d1, d2):
        fl = 2 * n * n * (d1 + d2)
    else:
        fl = 2 * n * (d1 * d2 + d1 * d1 + d2 * d2)
    cost = pl.CostEstimate(
        flops=int(p * fl), transcendentals=int(2 * p),
        bytes_accessed=int(p * pair_bytes + p * _OUT_SUB * _OUT_LANE * 4))
    out = pl.pallas_call(
        _make_small_kernel(b, n, d1, d2, use_bf16),
        out_shape=jax.ShapeDtypeStruct((p, _OUT_SUB, _OUT_LANE), jnp.float32),
        grid=(p // b,),
        in_specs=[
            pl.BlockSpec((b, n, d1), lambda i: (i, 0, 0)),
            pl.BlockSpec((b, n, d2), lambda i: (i, 0, 0)),
        ],
        out_specs=pl.BlockSpec((b, _OUT_SUB, _OUT_LANE), lambda i: (i, 0, 0)),
        compiler_params=pltpu.CompilerParams(
            dimension_semantics=("parallel",),
            vmem_limit_bytes=_vmem_limit_bytes()),
        cost_estimate=cost,
    )(xs, ys)
    return out[:, 0, 0]


# ---------------------------------------------------------------------------
# Large-pair path: batch(N)-chunk tiling with VMEM gram accumulators.
# ---------------------------------------------------------------------------
def _pick_chunk(n, d1, d2, itemsize):
    per_row = (d1 + d2) * (2 * itemsize + 4)   # double-buffered source + f32 copy
    chunk = _CHUNK_BLOCK_BYTES // max(per_row, 1)
    chunk = max(8, (chunk // 8) * 8)            # sublane-aligned
    n_cap = ((n + 7) // 8) * 8
    return int(min(chunk, n_cap))


def _make_tiled_kernel(n, chunk, d1, d2, use_bf16):
    needs_mask = (n % chunk) != 0
    inv_sqrt_n = 1.0 / math.sqrt(n)

    def kernel(x_ref, y_ref, out_ref, sxy, sxx, syy, sx, sy):
        k = pl.program_id(0)

        @pl.when(k == 0)
        def _():
            sxy[...] = jnp.zeros_like(sxy)
            sxx[...] = jnp.zeros_like(sxx)
            syy[...] = jnp.zeros_like(syy)
            sx[...] = jnp.zeros_like(sx)
            sy[...] = jnp.zeros_like(sy)

        x = x_ref[...].astype(jnp.float32) * inv_sqrt_n      # (chunk, D1)
        y = y_ref[...].astype(jnp.float32) * inv_sqrt_n      # (chunk, D2)
        if needs_mask:  # last chunk extends past N: zero the padded rows
            row = k * chunk + lax.broadcasted_iota(jnp.int32, (chunk, 1), 0)
            valid = row < n
            x = jnp.where(valid, x, 0.0)
            y = jnp.where(valid, y, 0.0)

        sx[...] += jnp.sum(x, axis=0, keepdims=True)         # (1, D1) column sums
        sy[...] += jnp.sum(y, axis=0, keepdims=True)         # (1, D2)

        xm = x.astype(jnp.bfloat16) if use_bf16 else x
        ym = y.astype(jnp.bfloat16) if use_bf16 else y
        xt = xm.T                                            # reused by the next 2 matmuls
        sxy[...] += jnp.dot(xt, ym, preferred_element_type=jnp.float32)
        sxx[...] += jnp.dot(xt, xm, preferred_element_type=jnp.float32)
        syy[...] += lax.dot_general(ym, ym, (((0,), (0,)), ((), ())),
                                    preferred_element_type=jnp.float32)

        @pl.when(k == pl.num_programs(0) - 1)
        def _():
            # Fold centering in analytically: G = S - (1/N) * colsum^T colsum.
            # One gram corrected + reduced at a time (single gram live).
            inv_n = jnp.float32(1.0 / n)
            mx, my = sx[...], sy[...]
            gxy = sxy[...] - inv_n * lax.dot_general(
                mx, my, (((0,), (0,)), ((), ())), preferred_element_type=jnp.float32)
            hsic_xy = jnp.sum(gxy * gxy)
            gxx = sxx[...] - inv_n * lax.dot_general(
                mx, mx, (((0,), (0,)), ((), ())), preferred_element_type=jnp.float32)
            hsic_xx = jnp.sum(gxx * gxx)
            gyy = syy[...] - inv_n * lax.dot_general(
                my, my, (((0,), (0,)), ((), ())), preferred_element_type=jnp.float32)
            hsic_yy = jnp.sum(gyy * gyy)
            cka = hsic_xy * lax.rsqrt(jnp.maximum(hsic_xx, _EPS)) \
                          * lax.rsqrt(jnp.maximum(hsic_yy, _EPS))
            out_ref[...] = jnp.full(out_ref.shape, jnp.float32(1.0) - cka,
                                    dtype=jnp.float32)

    return kernel


def _cka_pair_tiled(x2d, y2d, *, use_bf16=False, chunk=None):
    """One pair, batch-axis-tiled D-sided grams in VMEM scratch. Returns scalar loss."""
    n, d1 = x2d.shape
    d2 = y2d.shape[1]
    itemsize = max(x2d.dtype.itemsize, y2d.dtype.itemsize)
    if chunk is None:
        chunk = _pick_chunk(n, d1, d2, itemsize)
    # TODO(synk): when the DxD accumulators themselves exceed VMEM (huge D), add
    # N-sided gram-row tiling instead of D-sided accumulators.
    # TODO(synk): for a single large pair on v7x, split the N-chunks across the
    # two TensorCores (parallel leading axis + wrapper-side combine).
    num_chunks = pl.cdiv(n, chunk)
    cost = pl.CostEstimate(
        flops=int(2 * n * (d1 * d2 + d1 * d1 + d2 * d2)),
        transcendentals=2,
        bytes_accessed=int(n * (d1 * x2d.dtype.itemsize + d2 * y2d.dtype.itemsize)
                           + _OUT_SUB * _OUT_LANE * 4))
    out = pl.pallas_call(
        _make_tiled_kernel(n, chunk, d1, d2, use_bf16),
        out_shape=jax.ShapeDtypeStruct((_OUT_SUB, _OUT_LANE), jnp.float32),
        grid=(num_chunks,),
        in_specs=[
            pl.BlockSpec((chunk, d1), lambda k: (k, 0)),
            pl.BlockSpec((chunk, d2), lambda k: (k, 0)),
        ],
        out_specs=pl.BlockSpec((_OUT_SUB, _OUT_LANE), lambda k: (0, 0)),
        scratch_shapes=[
            pltpu.VMEM((d1, d2), jnp.float32),
            pltpu.VMEM((d1, d1), jnp.float32),
            pltpu.VMEM((d2, d2), jnp.float32),
            pltpu.VMEM((1, d1), jnp.float32),
            pltpu.VMEM((1, d2), jnp.float32),
        ],
        compiler_params=pltpu.CompilerParams(
            dimension_semantics=("arbitrary",),
            vmem_limit_bytes=_vmem_limit_bytes()),
        cost_estimate=cost,
    )(x2d, y2d)
    return out[0, 0]


# ---------------------------------------------------------------------------
# Forward wrapper (PyTorch CKA.forward equivalent).
# ---------------------------------------------------------------------------
def _flatten2d(f):
    f = jnp.asarray(f)
    if f.ndim == 0:
        return f.reshape(1, 1)
    if f.ndim == 1:
        return f.reshape(1, -1)
    if f.ndim == 2:
        return f
    return f.reshape(f.shape[0], -1)


def cka_forward(feat_s, feat_t, epoch_ratio=0.0, *, use_bf16_grams=False):
    """Mean over pairs of (1 - linear CKA) on (batch, -1)-flattened features."""
    del epoch_ratio  # unused in the reference forward
    pairs = []
    for fs, ft in zip(feat_s, feat_t):
        x2, y2 = _flatten2d(fs), _flatten2d(ft)
        if x2.shape[0] != y2.shape[0]:
            raise ValueError("CKA needs matching sample counts within a pair.")
        pairs.append((x2, y2))
    if not pairs:
        raise ValueError("CKA requires at least one (feat_s, feat_t) pair.")

    small_groups = {}
    tiled_pairs = []
    for x2, y2 in pairs:
        n, d1 = x2.shape
        d2 = y2.shape[1]
        itemsize = max(x2.dtype.itemsize, y2.dtype.itemsize)
        if _whole_pair_vmem_bytes(n, d1, d2, itemsize) <= _SMALL_PATH_LIMIT:
            key = (x2.shape, y2.shape, str(x2.dtype), str(y2.dtype))
            small_groups.setdefault(key, []).append((x2, y2))
        else:
            tiled_pairs.append((x2, y2))

    total = jnp.float32(0.0)
    cnt = 0
    # Small pairs: stack per shape-group (tiny copies) so B pairs can be packed
    # per grid step; large pairs bypass the stack entirely (memory-bound).
    for grp in small_groups.values():
        xs = jnp.stack([g[0] for g in grp], axis=0)
        ys = jnp.stack([g[1] for g in grp], axis=0)
        total = total + jnp.sum(_small_group_losses(xs, ys, use_bf16_grams))
        cnt += len(grp)
    for x2, y2 in tiled_pairs:
        total = total + _cka_pair_tiled(x2, y2, use_bf16=use_bf16_grams)
        cnt += 1
    return total / jnp.float32(cnt)


def _cka_loss_ref(x, y):
    """Pure-JAX reference for one pair (verification)."""
    x = _flatten2d(x).astype(jnp.float32)
    y = _flatten2d(y).astype(jnp.float32)
    x_c = x - jnp.mean(x, axis=0, keepdims=True)
    y_c = y - jnp.mean(y, axis=0, keepdims=True)
    hsic_xy = jnp.sum((x_c.T @ y_c) ** 2)
    hsic_xx = jnp.sum((x_c.T @ x_c) ** 2)
    hsic_yy = jnp.sum((y_c.T @ y_c) ** 2)
    return 1.0 - hsic_xy / (jnp.sqrt(hsic_xx) * jnp.sqrt(hsic_yy))


if __name__ == "__main__":
    key = jax.random.PRNGKey(0)
    keys = jax.random.split(key, 10)

    feat_s, feat_t = [], []
    # Two logit-like pairs (batch=8, hidden=32) -> N-sided small path, packed B=2.
    feat_s.append(jax.random.normal(keys[0], (8, 32), jnp.float32))
    feat_t.append(jax.random.normal(keys[1], (8, 32), jnp.float32))
    feat_s.append(jax.random.normal(keys[2], (8, 32), jnp.float32))
    feat_t.append(jax.random.normal(keys[3], (8, 32), jnp.float32))
    # One conv-feature pair (batch=2, channels=4, spatial=16x16) -> (2, 1024).
    feat_s.append(jax.random.normal(keys[4], (2, 4, 16, 16), jnp.float32))
    feat_t.append(jax.random.normal(keys[5], (2, 4, 16, 16), jnp.float32))
    # One narrow pair (batch=8, dim=4) -> D-sided small path.
    feat_s.append(jax.random.normal(keys[6], (8, 4), jnp.float32))
    feat_t.append(jax.random.normal(keys[7], (8, 4), jnp.float32))

    loss = jax.block_until_ready(cka_forward(feat_s, feat_t, epoch_ratio=0.5))
    ref = sum(_cka_loss_ref(fs, ft) for fs, ft in zip(feat_s, feat_t)) / len(feat_s)
    assert jnp.allclose(loss, ref, rtol=1e-4, atol=1e-5), (loss, ref)

    # Exercise the batch-tiled (large-pair) path at small shapes with a chunk
    # that does not divide N (4 grid steps, masked last chunk) and nonzero means
    # (checks the analytic centering correction).
    xt_ = jax.random.normal(keys[8], (100, 40), jnp.float32) + 0.5
    yt_ = jax.random.normal(keys[9], (100, 24), jnp.float32) - 0.25
    tiled = jax.block_until_ready(_cka_pair_tiled(xt_, yt_, chunk=32))
    tref = _cka_loss_ref(xt_, yt_)
    assert jnp.allclose(tiled, tref, rtol=5e-4, atol=1e-5), (tiled, tref)

    # Optional bf16 gram-operand fast path (loose tolerance).
    tiled_bf16 = jax.block_until_ready(
        _cka_pair_tiled(xt_, yt_, use_bf16=True, chunk=32))
    assert jnp.allclose(tiled_bf16, tref, rtol=5e-2, atol=1e-3), (tiled_bf16, tref)

    print("KERNEL_OK")
</pallas_src>

<mosaic_0001>
module attributes {stable_mosaic.version = 11 : i64} {
  func.func @kernel(%arg0: i32, %arg1: memref<2x8x32xf32, #tpu.memory_space<vmem>>, %arg2: memref<2x8x32xf32, #tpu.memory_space<vmem>>, %arg3: memref<2x8x128xf32, #tpu.memory_space<vmem>>) attributes {dimension_semantics = [#tpu.dimension_semantics<parallel>], iteration_bounds = array<i64: 1>, scalar_prefetch = 0 : i64, scratch_operands = 0 : i64, tpu.core_type = #tpu.core_type<tc>, window_params = [{transform_indices = @transform_0, window_bounds = array<i64: 2, 8, 32>}, {transform_indices = @transform_1, window_bounds = array<i64: 2, 8, 32>}, {transform_indices = @transform_2, window_bounds = array<i64: 2, 8, 128>}]} {
    %c0 = arith.constant 0 : index
    %c0_0 = arith.constant 0 : index
    %c0_1 = arith.constant 0 : index
    %0 = vector.load %arg1[%c0, %c0_0, %c0_1] : memref<2x8x32xf32, #tpu.memory_space<vmem>>, vector<1x8x32xf32>
    %1 = vector.shape_cast %0 : vector<1x8x32xf32> to vector<8x32xf32>
    %c0_2 = arith.constant 0 : index
    %c0_3 = arith.constant 0 : index
    %c0_4 = arith.constant 0 : index
    %2 = vector.load %arg2[%c0_2, %c0_3, %c0_4] : memref<2x8x32xf32, #tpu.memory_space<vmem>>, vector<1x8x32xf32>
    %3 = vector.shape_cast %2 : vector<1x8x32xf32> to vector<8x32xf32>
    %cst = arith.constant dense<0.000000e+00> : vector<32xf32>
    %4 = vector.multi_reduction <add>, %1, %cst [0] : vector<8x32xf32> to vector<32xf32>
    %5 = vector.shape_cast %4 : vector<32xf32> to vector<1x32xf32>
    %cst_5 = arith.constant 8.000000e+00 : f32
    %6 = vector.broadcast %cst_5 : f32 to vector<1x32xf32>
    %7 = arith.divf %5, %6 : vector<1x32xf32>
    %8 = vector.broadcast %7 : vector<1x32xf32> to vector<8x32xf32>
    %9 = arith.subf %1, %8 : vector<8x32xf32>
    %cst_6 = arith.constant 0.353553385 : f32
    %10 = vector.broadcast %cst_6 : f32 to vector<8x32xf32>
    %11 = arith.mulf %9, %10 : vector<8x32xf32>
    %cst_7 = arith.constant dense<0.000000e+00> : vector<32xf32>
    %12 = vector.multi_reduction <add>, %3, %cst_7 [0] : vector<8x32xf32> to vector<32xf32>
    %13 = vector.shape_cast %12 : vector<32xf32> to vector<1x32xf32>
    %cst_8 = arith.constant 8.000000e+00 : f32
    %14 = vector.broadcast %cst_8 : f32 to vector<1x32xf32>
    %15 = arith.divf %13, %14 : vector<1x32xf32>
    %16 = vector.broadcast %15 : vector<1x32xf32> to vector<8x32xf32>
    %17 = arith.subf %3, %16 : vector<8x32xf32>
    %cst_9 = arith.constant 0.353553385 : f32
    %18 = vector.broadcast %cst_9 : f32 to vector<8x32xf32>
    %19 = arith.mulf %17, %18 : vector<8x32xf32>
    %cst_10 = arith.constant dense<0.000000e+00> : vector<8x8xf32>
    %20 = tpu.matmul %11, %11, %cst_10 {dimension_numbers = #tpu.dot_dimension_numbers<[1], [1], [0], [0], [0, 0, 1, 0], [], []>} : vector<8x32xf32>, vector<8x32xf32>, vector<8x8xf32> -> vector<8x8xf32>
    %21 = arith.mulf %20, %20 : vector<8x8xf32>
    %22 = vector.shape_cast %21 : vector<8x8xf32> to vector<1x8x8xf32>
    %cst_11 = arith.constant dense<0.000000e+00> : vector<1xf32>
    %23 = vector.multi_reduction <add>, %22, %cst_11 [1, 2] : vector<1x8x8xf32> to vector<1xf32>
    %24 = vector.shape_cast %23 : vector<1xf32> to vector<1x1x1xf32>
    %25 = vector.extract %24[0, 0, 0] : f32 from vector<1x1x1xf32>
    %cst_12 = arith.constant dense<0.000000e+00> : vector<8x8xf32>
    %26 = tpu.matmul %19, %19, %cst_12 {dimension_numbers = #tpu.dot_dimension_numbers<[1], [1], [0], [0], [0, 0, 1, 0], [], []>} : vector<8x32xf32>, vector<8x32xf32>, vector<8x8xf32> -> vector<8x8xf32>
    %27 = arith.mulf %26, %26 : vector<8x8xf32>
    %28 = vector.shape_cast %27 : vector<8x8xf32> to vector<1x8x8xf32>
    %cst_13 = arith.constant dense<0.000000e+00> : vector<1xf32>
    %29 = vector.multi_reduction <add>, %28, %cst_13 [1, 2] : vector<1x8x8xf32> to vector<1xf32>
    %30 = vector.shape_cast %29 : vector<1xf32> to vector<1x1x1xf32>
    %31 = vector.extract %30[0, 0, 0] : f32 from vector<1x1x1xf32>
    %32 = arith.mulf %20, %26 : vector<8x8xf32>
    %33 = vector.shape_cast %32 : vector<8x8xf32> to vector<1x8x8xf32>
    %cst_14 = arith.constant dense<0.000000e+00> : vector<1xf32>
    %34 = vector.multi_reduction <add>, %33, %cst_14 [1, 2] : vector<1x8x8xf32> to vector<1xf32>
    %35 = vector.shape_cast %34 : vector<1xf32> to vector<1x1x1xf32>
    %36 = vector.extract %35[0, 0, 0] : f32 from vector<1x1x1xf32>
    %cst_15 = arith.constant 1.000000e-30 : f32
    %37 = arith.maximumf %25, %cst_15 : f32
    %38 = math.rsqrt %37 : f32
    %39 = arith.mulf %36, %38 : f32
    %cst_16 = arith.constant 1.000000e-30 : f32
    %40 = arith.maximumf %31, %cst_16 : f32
    %41 = math.rsqrt %40 : f32
    %42 = arith.mulf %39, %41 : f32
    %cst_17 = arith.constant 1.000000e+00 : f32
    %43 = arith.subf %cst_17, %42 : f32
    %44 = vector.broadcast %43 : f32 to vector<8x128xf32>
    %c0_18 = arith.constant 0 : index
    %c0_19 = arith.constant 0 : index
    %c0_20 = arith.constant 0 : index
    %45 = vector.load %arg3[%c0_18, %c0_19, %c0_20] : memref<2x8x128xf32, #tpu.memory_space<vmem>>, vector<1x8x128xf32>
    %46 = vector.shape_cast %45 : vector<1x8x128xf32> to vector<8x128xf32>
    %47 = vector.shape_cast %44 : vector<8x128xf32> to vector<1x8x128xf32>
    tpu.vector_store %arg3[%c0_18, %c0_19, %c0_20], %47 {strides = array<i32>} : memref<2x8x128xf32, #tpu.memory_space<vmem>>, vector<1x8x128xf32>,
    %c1 = arith.constant 1 : index
    %c0_21 = arith.constant 0 : index
    %c0_22 = arith.constant 0 : index
    %48 = vector.load %arg1[%c1, %c0_21, %c0_22] : memref<2x8x32xf32, #tpu.memory_space<vmem>>, vector<1x8x32xf32>
    %49 = vector.shape_cast %48 : vector<1x8x32xf32> to vector<8x32xf32>
    %c1_23 = arith.constant 1 : index
    %c0_24 = arith.constant 0 : index
    %c0_25 = arith.constant 0 : index
    %50 = vector.load %arg2[%c1_23, %c0_24, %c0_25] : memref<2x8x32xf32, #tpu.memory_space<vmem>>, vector<1x8x32xf32>
    %51 = vector.shape_cast %50 : vector<1x8x32xf32> to vector<8x32xf32>
    %cst_26 = arith.constant dense<0.000000e+00> : vector<32xf32>
    %52 = vector.multi_reduction <add>, %49, %cst_26 [0] : vector<8x32xf32> to vector<32xf32>
    %53 = vector.shape_cast %52 : vector<32xf32> to vector<1x32xf32>
    %cst_27 = arith.constant 8.000000e+00 : f32
    %54 = vector.broadcast %cst_27 : f32 to vector<1x32xf32>
    %55 = arith.divf %53, %54 : vector<1x32xf32>
    %56 = vector.broadcast %55 : vector<1x32xf32> to vector<8x32xf32>
    %57 = arith.subf %49, %56 : vector<8x32xf32>
    %cst_28 = arith.constant 0.353553385 : f32
    %58 = vector.broadcast %cst_28 : f32 to vector<8x32xf32>
    %59 = arith.mulf %57, %58 : vector<8x32xf32>
    %cst_29 = arith.constant dense<0.000000e+00> : vector<32xf32>
    %60 = vector.multi_reduction <add>, %51, %cst_29 [0] : vector<8x32xf32> to vector<32xf32>
    %61 = vector.shape_cast %60 : vector<32xf32> to vector<1x32xf32>
    %cst_30 = arith.constant 8.000000e+00 : f32
    %62 = vector.broadcast %cst_30 : f32 to vector<1x32xf32>
    %63 = arith.divf %61, %62 : vector<1x32xf32>
    %64 = vector.broadcast %63 : vector<1x32xf32> to vector<8x32xf32>
    %65 = arith.subf %51, %64 : vector<8x32xf32>
    %cst_31 = arith.constant 0.353553385 : f32
    %66 = vector.broadcast %cst_31 : f32 to vector<8x32xf32>
    %67 = arith.mulf %65, %66 : vector<8x32xf32>
    %cst_32 = arith.constant dense<0.000000e+00> : vector<8x8xf32>
    %68 = tpu.matmul %59, %59, %cst_32 {dimension_numbers = #tpu.dot_dimension_numbers<[1], [1], [0], [0], [0, 0, 1, 0], [], []>} : vector<8x32xf32>, vector<8x32xf32>, vector<8x8xf32> -> vector<8x8xf32>
    %69 = arith.mulf %68, %68 : vector<8x8xf32>
    %70 = vector.shape_cast %69 : vector<8x8xf32> to vector<1x8x8xf32>
    %cst_33 = arith.constant dense<0.000000e+00> : vector<1xf32>
    %71 = vector.multi_reduction <add>, %70, %cst_33 [1, 2] : vector<1x8x8xf32> to vector<1xf32>
    %72 = vector.shape_cast %71 : vector<1xf32> to vector<1x1x1xf32>
    %73 = vector.extract %72[0, 0, 0] : f32 from vector<1x1x1xf32>
    %cst_34 = arith.constant dense<0.000000e+00> : vector<8x8xf32>
    %74 = tpu.matmul %67, %67, %cst_34 {dimension_numbers = #tpu.dot_dimension_numbers<[1], [1], [0], [0], [0, 0, 1, 0], [], []>} : vector<8x32xf32>, vector<8x32xf32>, vector<8x8xf32> -> vector<8x8xf32>
    %75 = arith.mulf %74, %74 : vector<8x8xf32>
    %76 = vector.shape_cast %75 : vector<8x8xf32> to vector<1x8x8xf32>
    %cst_35 = arith.constant dense<0.000000e+00> : vector<1xf32>
    %77 = vector.multi_reduction <add>, %76, %cst_35 [1, 2] : vector<1x8x8xf32> to vector<1xf32>
    %78 = vector.shape_cast %77 : vector<1xf32> to vector<1x1x1xf32>
    %79 = vector.extract %78[0, 0, 0] : f32 from vector<1x1x1xf32>
    %80 = arith.mulf %68, %74 : vector<8x8xf32>
    %81 = vector.shape_cast %80 : vector<8x8xf32> to vector<1x8x8xf32>
    %cst_36 = arith.constant dense<0.000000e+00> : vector<1xf32>
    %82 = vector.multi_reduction <add>, %81, %cst_36 [1, 2] : vector<1x8x8xf32> to vector<1xf32>
    %83 = vector.shape_cast %82 : vector<1xf32> to vector<1x1x1xf32>
    %84 = vector.extract %83[0, 0, 0] : f32 from vector<1x1x1xf32>
    %cst_37 = arith.constant 1.000000e-30 : f32
    %85 = arith.maximumf %73, %cst_37 : f32
    %86 = math.rsqrt %85 : f32
    %87 = arith.mulf %84, %86 : f32
    %cst_38 = arith.constant 1.000000e-30 : f32
    %88 = arith.maximumf %79, %cst_38 : f32
    %89 = math.rsqrt %88 : f32
    %90 = arith.mulf %87, %89 : f32
    %cst_39 = arith.constant 1.000000e+00 : f32
    %91 = arith.subf %cst_39, %90 : f32
    %92 = vector.broadcast %91 : f32 to vector<8x128xf32>
    %c1_40 = arith.constant 1 : index
    %c0_41 = arith.constant 0 : index
    %c0_42 = arith.constant 0 : index
    %93 = vector.load %arg3[%c1_40, %c0_41, %c0_42] : memref<2x8x128xf32, #tpu.memory_space<vmem>>, vector<1x8x128xf32>
    %94 = vector.shape_cast %93 : vector<1x8x128xf32> to vector<8x128xf32>
    %95 = vector.shape_cast %92 : vector<8x128xf32> to vector<1x8x128xf32>
    tpu.vector_store %arg3[%c1_40, %c0_41, %c0_42], %95 {strides = array<i32>} : memref<2x8x128xf32, #tpu.memory_space<vmem>>, vector<1x8x128xf32>,
    return
  }
  func.func @transform_0(%arg0: i32) -> (i32, i32, i32) {
    %c0_i32 = arith.constant 0 : i32
    %c0_i32_0 = arith.constant 0 : i32
    %c0_i32_1 = arith.constant 0 : i32
    return %arg0, %c0_i32, %c0_i32_0 : i32, i32, i32
  }
  func.func @transform_1(%arg0: i32) -> (i32, i32, i32) {
    %c0_i32 = arith.constant 0 : i32
    %c0_i32_0 = arith.constant 0 : i32
    %c0_i32_1 = arith.constant 0 : i32
    return %arg0, %c0_i32, %c0_i32_0 : i32, i32, i32
  }
  func.func @transform_2(%arg0: i32) -> (i32, i32, i32) {
    %c0_i32 = arith.constant 0 : i32
    %c0_i32_0 = arith.constant 0 : i32
    %c0_i32_1 = arith.constant 0 : i32
    return %arg0, %c0_i32, %c0_i32_0 : i32, i32, i32
  }
}

</mosaic_0001>

<bundles_post_ra>
// kernel: tpu_custom_call.1
= control target key start
LH: loop header
LB: loop body
LE: loop exit
PB: predicated region body
PF: predicated region fallthrough
CT: control target
= control target key end

     0   :  { %7 = vsyncpa [#allocation3], 0  ;;  %s730_s0 = inlined_call_operand.hbm [shape: f32[2,8,32], index: 0, kind: input, shape index: {}]   ;;  %s731_s1 = inlined_call_operand.hbm [shape: f32[2,8,32], index: 1, kind: input, shape index: {}]   ;;  %s732_s2 = inlined_call_operand.hbm [shape: f32[2,8,128], index: 2, kind: output, shape index: {}]  }
   0x1   :  { %8 = vsyncpa [#allocation6], 0 }
   0x2   :  { %9 = vsyncpa [#allocation4], 0  ;;  %s636_s9 = smov [#allocation2]   ;;  %s564_s13 = scalar_lea.hbm %s730_s0, 256 }
   0x3   :  { %s15_s10 = sshll.u32 %s636_s9, 4  ;;  %p565_p0 = scmp.ne.s32.totalorder %s730_s0, %s564_s13  ;;  %s16_s10 = int_to_ptr.vmem [resolvable:$true] %s15_s10 }
   0x4   :  { %p568_p1 = scmp.lt.u32.totalorder %s564_s13, %s730_s0 }
   0x6   :  { %p570_p2 = pnand %p568_p1, %p565_p0 }
   0x8   :  { %573 = shalt.err (!%p570_p2)
}
   0x9   :  { %s574_s18 = scalar_lea.vmem %s16_s10, 256  ;;  %p579_p4 = scmp.lt.s32.totalorder %s16_s10, %s16_s10 }
   0xa   :  { %p575_p3 = scmp.ne.s32.totalorder %s16_s10, %s574_s18  ;;  %p580_p5 = scmp.lt.s32.totalorder %s574_s18, %s574_s18 }
   0xc   :  { %p581_p6 = por %p580_p5, %p579_p4 }
   0xe   :  { %p582_p7 = pnand %p581_p6, %p575_p3 }
  0x10   :  { %585 = shalt.err (!%p582_p7)
}
  0x11   :  { %s637_s19 = smov 128   ;;  %s638_s20 = smov 8  }
  0x12   :  { %21 = dma.hbm_to_vmem [thread:$0]  %s730_s0, 256, %s16_s10, [#allocation3], %s637_s19, %s637_s19, %s638_s20  }
  0x13   :  { %s639_s23 = smov [#allocation5]   ;;  %s586_s27 = scalar_lea.hbm %s731_s1, 256 }
  0x14   :  { %s27_s24 = sshll.u32 %s639_s23, 4  ;;  %p587_p8 = scmp.ne.s32.totalorder %s731_s1, %s586_s27  ;;  %s28_s24 = int_to_ptr.vmem [resolvable:$true] %s27_s24 }
  0x15   :  { %p590_p9 = scmp.lt.u32.totalorder %s586_s27, %s731_s1 }
  0x17   :  { %p592_p10 = pnand %p590_p9, %p587_p8 }
  0x19   :  { %595 = shalt.err (!%p592_p10)
}
  0x1a   :  { %s596_s4 = scalar_lea.vmem %s28_s24, 256  ;;  %p601_p12 = scmp.lt.s32.totalorder %s28_s24, %s28_s24 }
  0x1b   :  { %p597_p11 = scmp.ne.s32.totalorder %s28_s24, %s596_s4  ;;  %p602_p13 = scmp.lt.s32.totalorder %s596_s4, %s596_s4 }
  0x1d   :  { %p603_p0 = por %p602_p13, %p601_p12 }
  0x1f   :  { %p604_p1 = pnand %p603_p0, %p597_p11 }
  0x21   :  { %607 = shalt.err (!%p604_p1)
}
  0x22   :  { %33 = dma.hbm_to_vmem [thread:$0]  %s731_s1, 256, %s28_s24, [#allocation6], %s637_s19, %s637_s19, %s638_s20  }
  0x23   :  { %630 = dma.done.wait [#allocation3], 256  }
  0x24   :  { %631 = vsyncadd [#allocation3], 4294967040 }
  0x25   :  { %632 = dma.done.wait [#allocation6], 256  }
  0x26   :  { %633 = vsyncadd [#allocation6], 4294967040  ;;  %v640_v0 = vmov 0.0   ;;  %vm641_vm0 = vmmov 0   ;;  %vm42_vm1 = vcmask 261120   ;;  %v40_v1 = vld [vmem:[#allocation2] sm:$0xff] }
  0x27   :  { %508 = vmatprep.subr.mxu0 %v640_v0  ;;  %513 = vmatprep.subr.mxu1 %v640_v0  ;;  %v41_v2 = vld [vmem:[#allocation5] sm:$0xff]  ;;  %v258_v3 = vld [vmem:[#allocation2 + $0x8] sm:$0xff]  ;;  %v43_v4 = vsel %vm42_vm1, %v40_v1, 0.0  ;;  %v260_v7 = vld [vmem:[#allocation5 + $0x8] sm:$0xff]  ;;  %vm138_vm2 = vcmask 64512   ;;  %s643_s27 = smov [#allocation7]  }
  0x28   :  { %510 = vmatprep.mubr.msk.f32.mxu0 %vm641_vm0, %v640_v0  ;;  %515 = vmatprep.mubr.msk.f32.mxu1 %vm641_vm0, %v640_v0  ;;  %v54_v5 = vsel %vm42_vm1, %v41_v2, 0.0  ;;  %v261_v6 = vsel %vm42_vm1, %v258_v3, 0.0  ;;  %v44_v8 = vrot.slane %v43_v4, 4  ;;  %v271_v11 = vsel %vm42_vm1, %v260_v7, 0.0  ;;  %s642_s6 = smov 1e-30  }
  0x29   :  { %v55_v9 = vrot.slane %v54_v5, 4  ;;  %v262_v10 = vrot.slane %v261_v6, 4  ;;  %v272_v12 = vrot.slane %v271_v11, 4  ;;  %s479_s28 = sshll.u32 %s643_s27, 4  ;;  %s480_s28 = int_to_ptr.vmem [resolvable:$true] %s479_s28 }
  0x2a   :  { %v45_v13 = vadd.f32 %v44_v8, %v43_v4  ;;  %s608_s30 = scalar_lea.vmem %s480_s28, 256  ;;  %p613_p3 = scmp.lt.s32.totalorder %s480_s28, %s480_s28 }
  0x2b   :  { %v56_v14 = vadd.f32 %v55_v9, %v54_v5  ;;  %v263_v15 = vadd.f32 %v262_v10, %v261_v6  ;;  %v273_v16 = vadd.f32 %v272_v12, %v271_v11  ;;  %p609_p2 = scmp.ne.s32.totalorder %s480_s28, %s608_s30  ;;  %p614_p4 = scmp.lt.s32.totalorder %s608_s30, %s608_s30 }
  0x2c   :  { %v46_v17 = vrot.slane %v45_v13, 2 }
  0x2d   :  { %v57_v18 = vrot.slane %v56_v14, 2  ;;  %v264_v19 = vrot.slane %v263_v15, 2  ;;  %v274_v20 = vrot.slane %v273_v16, 2  ;;  %p615_p5 = por %p614_p4, %p613_p3 }
  0x2e   :  { %v47_v21 = vadd.f32 %v46_v17, %v45_v13 }
  0x2f   :  { %v58_v22 = vadd.f32 %v57_v18, %v56_v14  ;;  %v265_v23 = vadd.f32 %v264_v19, %v263_v15  ;;  %v275_v24 = vadd.f32 %v274_v20, %v273_v16  ;;  %p616_p6 = pnand %p615_p5, %p609_p2 }
  0x30   :  { %v48_v25 = vrot.slane %v47_v21, 1 }
  0x31   :  { %v59_v26 = vrot.slane %v58_v22, 1  ;;  %v266_v27 = vrot.slane %v265_v23, 1  ;;  %v276_v28 = vrot.slane %v275_v24, 1 }
  0x32   :  { %v49_v29 = vadd.f32 %v48_v25, %v47_v21 }
  0x33   :  { %v60_v30 = vadd.f32 %v59_v26, %v58_v22  ;;  %v267_v31 = vadd.f32 %v266_v27, %v265_v23  ;;  %v277_v32 = vadd.f32 %v276_v28, %v275_v24 }
  0x34   :  { %v51_v33 = vmul.f32 0.125, %v49_v29 }
  0x35   :  { %v61_v34 = vmul.f32 0.125, %v60_v30  ;;  %v268_v35 = vmul.f32 0.125, %v267_v31  ;;  %v278_v36 = vmul.f32 0.125, %v277_v32 }
  0x36   :  { %v52_v37 = vsub.f32 %v40_v1, %v51_v33 }
  0x37   :  { %v62_v38 = vsub.f32 %v41_v2, %v61_v34  ;;  %v269_v39 = vsub.f32 %v258_v3, %v268_v35  ;;  %v279_v40 = vsub.f32 %v260_v7, %v278_v36 }
  0x38   :  { %v53_v41 = vmul.f32 0.35355338, %v52_v37 }
  0x39   :  { %v63_v42 = vmul.f32 0.35355338, %v62_v38  ;;  %v270_v43 = vmul.f32 0.35355338, %v269_v39  ;;  %v280_v44 = vmul.f32 0.35355338, %v279_v40 }
  0x3a   :  { %509 = vmatpush3.xpose.msk.msra.mxu0 %vm42_vm1, %v53_v41 }
  0x3b   :  { %514 = vmatpush3.xpose.msk.msra.mxu1 %vm42_vm1, %v63_v42  ;;  %518 = vmatprep.subr.mxu0 %v640_v0 }
  0x3c   :  { %523 = vmatprep.subr.mxu1 %v640_v0 }
  0x3d   :  { %511 = vmatmul.mubr.msk.f32.vlgmr.msra.gmra.mrb[0].mxu0 %vm42_vm1, %v53_v41 }
  0x3e   :  { %516 = vmatmul.mubr.msk.f32.vlgmr.msra.gmra.mrb[0].mxu1 %vm42_vm1, %v63_v42  ;;  %519 = vmatpush3.xpose.msk.msra.mxu0 %vm42_vm1, %v270_v43 }
  0x3f   :  { %520 = vmatprep.mubr.msk.f32.mxu0 %vm641_vm0, %v640_v0  ;;  %524 = vmatpush3.xpose.msk.msra.mxu1 %vm42_vm1, %v280_v44 }
  0x40   :  { %525 = vmatprep.mubr.msk.f32.mxu1 %vm641_vm0, %v640_v0 }
  0x41   :  { %521 = vmatmul.mubr.msk.f32.vlgmr.msra.gmra.mrb[2].mxu0 %vm42_vm1, %v270_v43 }
  0x42   :  { %526 = vmatmul.mubr.msk.f32.vlgmr.msra.gmra.mrb[2].mxu1 %vm42_vm1, %v280_v44 }
 0x110   :  { %v133_v45 = vpop.f32.mrb[0].mxu0 }
 0x111   :  { %v218_v46 = vpop.f32.mrb[0].mxu1  ;;  %v512_v48 = vpop.f32.mrb[1].mxu0  ;;  %v137_v51 = vmul.f32 %v133_v45, %v133_v45 }
 0x112   :  { %v222_v47 = vmul.f32 %v218_v46, %v218_v46  ;;  %v517_v49 = vpop.f32.mrb[1].mxu1  ;;  %v233_v50 = vmul.f32 %v218_v46, %v133_v45 }
 0x113   :  { %v139_v53 = vsel %vm138_vm2, %v137_v51, 0.0 }
 0x114   :  { %v234_v52 = vsel %vm138_vm2, %v233_v50, 0.0  ;;  %140 = vadd.xlane.f32.xlu0 %v139_v53  ;;  %v350_v54 = vpop.f32.mrb[2].mxu0  ;;  %v223_v55 = vsel %vm138_vm2, %v222_v47, 0.0 }
 0x115   :  { %235 = vadd.xlane.f32.xlu1 %v234_v52  ;;  %v354_v56 = vmul.f32 %v350_v54, %v350_v54  ;;  %v434_v57 = vpop.f32.mrb[2].mxu1  ;;  %v522_v58 = vpop.f32.mrb[3].mxu0 }
 0x116   :  { %v438_v59 = vmul.f32 %v434_v57, %v434_v57  ;;  %v449_v60 = vmul.f32 %v434_v57, %v350_v54  ;;  %v527_v61 = vpop.f32.mrb[3].mxu1 }
 0x117   :  { %v355_v62 = vsel %vm138_vm2, %v354_v56, 0.0 }
 0x118   :  { %224 = vadd.xlane.f32.xlu0 %v223_v55  ;;  %v450_v63 = vsel %vm138_vm2, %v449_v60, 0.0  ;;  %v439_v0 = vsel %vm138_vm2, %v438_v59, 0.0 }
 0x119   :  { %356 = vadd.xlane.f32.xlu1 %v355_v62 }
 0x11c   :  { %440 = vadd.xlane.f32.xlu0 %v439_v0 }
 0x11d   :  { %451 = vadd.xlane.f32.xlu1 %v450_v63 }
 0x1a1   :  { %v141_v2 = vpop.xlane.xlu0 %140 }
 0x1a2   :  { %v236_v1 = vpop.xlane.xlu1 %235  ;;  %v142_v4 = vrot.slane %v141_v2, 4 }
 0x1a3   :  { %v237_v3 = vrot.slane %v236_v1, 4 }
 0x1a4   :  { %v143_v6 = vadd.f32 %v142_v4, %v141_v2 }
 0x1a5   :  { %v238_v5 = vadd.f32 %v237_v3, %v236_v1  ;;  %v225_v7 = vpop.xlane.xlu0 %224 }
 0x1a6   :  { %v144_v9 = vrot.slane %v143_v6, 2  ;;  %v226_v10 = vrot.slane %v225_v7, 4  ;;  %v357_v22 = vpop.xlane.xlu1 %356 }
 0x1a7   :  { %v239_v8 = vrot.slane %v238_v5, 2  ;;  %v358_v25 = vrot.slane %v357_v22, 4 }
 0x1a8   :  { %v227_v11 = vadd.f32 %v226_v10, %v225_v7  ;;  %v145_v12 = vadd.f32 %v144_v9, %v143_v6 }
 0x1a9   :  { %v240_v13 = vadd.f32 %v239_v8, %v238_v5  ;;  %v441_v23 = vpop.xlane.xlu0 %440  ;;  %v359_v28 = vadd.f32 %v358_v25, %v357_v22 }
 0x1aa   :  { %v228_v14 = vrot.slane %v227_v11, 2  ;;  %v146_v15 = vrot.slane %v145_v12, 1  ;;  %v452_v24 = vpop.xlane.xlu1 %451  ;;  %v442_v26 = vrot.slane %v441_v23, 4 }
 0x1ab   :  { %v241_v18 = vrot.slane %v240_v13, 1  ;;  %v453_v27 = vrot.slane %v452_v24, 4  ;;  %v360_v32 = vrot.slane %v359_v28, 2 }
 0x1ac   :  { %v147_v16 = vadd.f32 %v146_v15, %v145_v12  ;;  %v229_v17 = vadd.f32 %v228_v14, %v227_v11  ;;  %v443_v30 = vadd.f32 %v442_v26, %v441_v23 }
 0x1ad   :  { %v242_v21 = vadd.f32 %v241_v18, %v240_v13  ;;  %v454_v31 = vadd.f32 %v453_v27, %v452_v24  ;;  %v361_v36 = vadd.f32 %v360_v32, %v359_v28 }
 0x1ae   :  { %528 = vpush %v147_v16  ;;  %v230_v19 = vrot.slane %v229_v17, 1  ;;  %v444_v33 = vrot.slane %v443_v30, 2 }
 0x1af   :  { %v455_v35 = vrot.slane %v454_v31, 2  ;;  %v362_v40 = vrot.slane %v361_v36, 1 }
 0x1b0   :  { %v231_v20 = vadd.f32 %v230_v19, %v229_v17  ;;  %v445_v37 = vadd.f32 %v444_v33, %v443_v30 }
 0x1b1   :  { %v456_v38 = vadd.f32 %v455_v35, %v454_v31  ;;  %v363_v44 = vadd.f32 %v362_v40, %v361_v36 }
 0x1b2   :  { %530 = vpush %v231_v20  ;;  %v446_v41 = vrot.slane %v445_v37, 1 }
 0x1b3   :  { %532 = vpush %v242_v21  ;;  %v457_v42 = vrot.slane %v456_v38, 1 }
 0x1b4   :  { %v447_v45 = vadd.f32 %v446_v41, %v445_v37 }
 0x1b5   :  { %v458_v46 = vadd.f32 %v457_v42, %v456_v38 }
 0x1df   :  { %s529_s1 = spop %528 }
 0x1e0   :  { %s244_s7 = smax.f32 %s642_s6, %s529_s1 }
 0x1e1   :  { %v245_v29 = vstv %s244_s7 }
 0x1e2   :  { %556 = vrsqrt.f32 %v245_v29 }
 0x1e3   :  { %s531_s8 = spop %530 }
 0x1e4   :  { %s249_s9 = smax.f32 %s642_s6, %s531_s8  ;;  %s533_s10 = spop %532 }
 0x1e5   :  { %v250_v34 = vstv %s249_s9 }
 0x1e6   :  { %558 = vrsqrt.f32 %v250_v34 }
 0x1ec   :  { %v557_v39 = vpop.eup %556 }
 0x1ed   :  { %534 = vpush %v557_v39 }
 0x1f0   :  { %v559_v43 = vpop.eup %558 }
 0x1f1   :  { %536 = vpush %v559_v43 }
 0x1f2   :  { %538 = vpush %v363_v44 }
 0x1f3   :  { %540 = vpush %v447_v45 }
 0x1f4   :  { %542 = vpush %v458_v46 }
 0x21e   :  { %s535_s11 = spop %534 }
 0x21f   :  { %s248_s12 = smul.f32 %s535_s11, %s533_s10 }
 0x222   :  { %s537_s13 = spop %536 }
 0x223   :  { %s253_s14 = smul.f32 %s537_s13, %s248_s12  ;;  %s539_s15 = spop %538 }
 0x224   :  { %s460_s16 = smax.f32 %s642_s6, %s539_s15  ;;  %s541_s17 = spop %540 }
 0x225   :  { %s254_s18 = ssub.f32 1.0, %s253_s14  ;;  %v461_v47 = vstv %s460_s16  ;;  %s465_s21 = smax.f32 %s642_s6, %s541_s17 }
 0x226   :  { %560 = vrsqrt.f32 %v461_v47  ;;  %v466_v48 = vstv %s465_s21  ;;  %s543_s22 = spop %542 }
 0x227   :  { %v255_v49 = vstv %s254_s18  ;;  %562 = vrsqrt.f32 %v466_v48 }
 0x228   :  { %256 = vst [vmem:[#allocation7] sm:$0xff] %v255_v49 }
 0x230   :  { %v561_v50 = vpop.eup %560 }
 0x231   :  { %v563_v51 = vpop.eup %562  ;;  %544 = vpush %v561_v50 }
 0x232   :  { %546 = vpush %v563_v51 }
 0x262   :  { %s545_s23 = spop %544 }
 0x263   :  { %s464_s24 = smul.f32 %s545_s23, %s543_s22  ;;  %s547_s25 = spop %546 }
 0x265   :  { %s469_s26 = smul.f32 %s547_s25, %s464_s24 }
 0x267   :  { %s470_s29 = ssub.f32 1.0, %s469_s26 }
 0x269   :  { %v471_v52 = vstv %s470_s29 }
 0x26a   :  { %473 = vst [vmem:[#allocation7 + $0x8] sm:$0xff] %v471_v52 }
 0x26b   :  { %619 = shalt.err (!%p616_p6)
}
 0x26c   :  { %s620_s0 = scalar_lea.hbm %s732_s2, 256 }
 0x26d   :  { %p621_p7 = scmp.ne.s32.totalorder %s732_s2, %s620_s0  ;;  %p624_p8 = scmp.lt.u32.totalorder %s620_s0, %s732_s2 }
 0x26f   :  { %p626_p9 = pnand %p624_p8, %p621_p7 }
 0x271   :  { %629 = shalt.err (!%p626_p9)
}
 0x272   :  { %485 = dma.vmem_to_hbm [thread:$0]  %s480_s28, 256, %s732_s2, [#allocation4], %s637_s19, %s637_s19, %s638_s20  }
 0x273   :  { %634 = dma.done.wait [#allocation4], 256  }
 0x274   :  { %635 = vsyncadd [#allocation4], 4294967040 }
 0x275   :  { %489 = vsyncpa [#allocation3], 1 }
 0x276   :  { %490 = vsyncpa [#allocation6], 1 }
 0x277   :  { %491 = vsyncpa [#allocation4], 1 }

</bundles_post_ra>
